<compile_context>
chip_gen: v6e
topology: v6e:2x2x1
jax: 0.10.0
libtpu: 0.0.40
codegen_flags: <defaults>
</compile_context>

<pallas_src>
import functools
import math

import jax
import jax.numpy as jnp
from jax.experimental import pallas as pl
from jax.experimental.pallas import tpu as pltpu

EPS = 1e-4
_LOG_EPS = math.log(EPS)


def _emocot_kernel(tgt_ref, *refs, num_heads, b_total, log_eps):
    # tgt_ref           : (TB, 1) int32 in VMEM (-1 == ignore)
    # refs[:num_heads]  : D x (TB, C) logits in VMEM (native dtype)
    # refs[num_heads]   : (1, 3) f32 SMEM output block:
    #                     [masked NLL sum, n_valid, KL sum] for this tile.
    pred_refs = refs[:num_heads]
    out_ref = refs[num_heads]
    tb, c = pred_refs[0].shape

    tgt = tgt_ref[...]                                   # (TB, 1)
    valid = tgt != -1
    validf = valid.astype(jnp.float32)                   # (TB, 1)

    # Rows past the true batch size are padding: their targets were padded
    # with -1 (CE ignores them) and we zero their probabilities so the JS
    # term ignores them as well.
    row_ids = (jax.lax.broadcasted_iota(jnp.int32, (tb, 1), 0)
               + pl.program_id(0) * tb)
    rowf = (row_ids < b_total).astype(jnp.float32)       # (TB, 1)

    class_ids = jax.lax.broadcasted_iota(jnp.int32, (tb, c), 1)   # (TB, C)
    tgt_mask = class_ids == jnp.where(valid, tgt, 0)              # (TB, C)

    nll_sum = jnp.float32(0.0)     # sum over heads & valid rows of -log p[tgt]
    plogp_sum = jnp.float32(0.0)   # sum_{d,b,c} p_d * clamp(log p_d)
    psum = jnp.zeros((tb, c), jnp.float32)   # sum_d p_d (real rows only)

    for d in range(num_heads):
        x = pred_refs[d][...].astype(jnp.float32)        # (TB, C)
        mx = jnp.max(x, axis=-1, keepdims=True)
        shifted = x - mx
        ex = jnp.exp(shifted)
        denom = jnp.sum(ex, axis=-1, keepdims=True)      # (TB, 1)
        logprobs = shifted - jnp.log(denom)              # log_softmax (TB, C)
        probs = ex * pl.reciprocal(denom, approx=False)  # softmax    (TB, C)

        # masked cross-entropy contribution of this head (no f32 one-hot)
        nll = -jnp.sum(jnp.where(tgt_mask, logprobs, 0.0),
                       axis=-1, keepdims=True)           # (TB, 1)
        nll_sum += jnp.sum(nll * validf)

        # JS accumulators; log p reused from log-softmax (log is monotone, so
        # max(log p, log eps) == log(clamp(p, eps))).
        probs = probs * rowf
        plogp_sum += jnp.sum(probs * jnp.maximum(logprobs, log_eps))
        psum = psum + probs

    # sum_{d,b,c} p_d * (clamp(log p_d) - log(clamp(mean_d p_d, eps)))
    mean_dist = jnp.maximum(psum * (1.0 / num_heads), EPS)
    kl_sum = plogp_sum - jnp.sum(psum * jnp.log(mean_dist))

    out_ref[0, 0] = nll_sum
    out_ref[0, 1] = jnp.sum(validf)
    out_ref[0, 2] = kl_sum


def _choose_batch_tile(b, c, d, itemsize):
    """Largest multiple-of-8 batch tile whose working set fits ~20 MiB."""
    budget = 20 * 1024 * 1024
    # double-buffered inputs for all heads + ~6 live f32 (TB, C) temporaries
    per_row = 2 * d * c * itemsize + 6 * c * 4 + 16
    tb = budget // per_row
    tb = min(tb, 2048)
    tb = max(tb, 8)
    tb = (tb // 8) * 8
    b_ceil = ((b + 7) // 8) * 8
    return min(tb, b_ceil)


def emocot_loss(preds, targets, *, lambda_js=100.0, lambda_exp=1.0,
                block_b=None):
    """preds: list/tuple of (B, C) logits; targets: (B,) ints, -1 = ignore."""
    preds = list(preds)
    num_heads = len(preds)
    b, c = preds[0].shape
    itemsize = jnp.dtype(preds[0].dtype).itemsize

    tb = block_b if block_b is not None else _choose_batch_tile(
        b, c, num_heads, itemsize)
    num_blocks = int(pl.cdiv(b, tb))
    b_pad = num_blocks * tb

    tgt = targets.astype(jnp.int32).reshape(b, 1)
    if b_pad != b:
        pad = b_pad - b
        preds = [jnp.pad(p, ((0, pad), (0, 0))) for p in preds]
        tgt = jnp.pad(tgt, ((0, pad), (0, 0)), constant_values=-1)

    kernel = functools.partial(
        _emocot_kernel, num_heads=num_heads, b_total=b, log_eps=_LOG_EPS)

    partials = pl.pallas_call(
        kernel,
        out_shape=jax.ShapeDtypeStruct((num_blocks, 3), jnp.float32),
        grid=(num_blocks,),
        in_specs=[pl.BlockSpec((tb, 1), lambda i: (i, 0))]
        + [pl.BlockSpec((tb, c), lambda i: (i, 0)) for _ in range(num_heads)],
        out_specs=pl.BlockSpec(
            (1, 3), lambda i: (i, 0), memory_space=pltpu.MemorySpace.SMEM),
        compiler_params=pltpu.CompilerParams(
            dimension_semantics=("parallel",),
            vmem_limit_bytes=48 * 1024 * 1024,
        ),
    )(tgt, *preds)

    nll_sum = jnp.sum(partials[:, 0])
    n_valid = jnp.maximum(jnp.sum(partials[:, 1]), 1.0)  # guard: all ignored
    kl_sum = jnp.sum(partials[:, 2])

    loss_exp = nll_sum / (n_valid * num_heads)
    js = kl_sum / (num_heads * b * c)
    return loss_exp * lambda_exp + js * lambda_js


def emocot_loss_ref(preds, targets, *, lambda_js=100.0, lambda_exp=1.0):
    """Pure-JAX reference matching the PyTorch module."""
    D = len(preds)
    mask = targets != -1
    n_valid = jnp.sum(mask.astype(jnp.float32))
    loss_exp = 0.0
    for p in preds:
        lp = jax.nn.log_softmax(p.astype(jnp.float32), axis=1)
        nll = -jnp.take_along_axis(
            lp, jnp.where(mask, targets, 0)[:, None].astype(jnp.int32), axis=1
        )[:, 0]
        loss_exp = loss_exp + jnp.sum(nll * mask) / n_valid
    loss_exp = loss_exp / D

    probs = [jax.nn.softmax(p.astype(jnp.float32), axis=1) for p in preds]
    w = 1.0 / D
    mean_dist = jnp.maximum(sum(w * p for p in probs), EPS)
    js = 0.0
    for p in probs:
        elem = jnp.where(
            p > 0, p * (jnp.log(jnp.maximum(p, EPS)) - jnp.log(mean_dist)), 0.0
        )
        js = js + w * jnp.mean(elem)
    return loss_exp * lambda_exp + js * lambda_js


if __name__ == "__main__":
    key = jax.random.PRNGKey(0)

    # --- test 1: small canonical case (B=8, C=8, D=2 heads) ---------------
    k1, k2, k3 = jax.random.split(key, 3)
    B, C = 8, 8
    pred0 = jax.random.normal(k1, (B, C), dtype=jnp.float32)
    pred1 = jax.random.normal(k2, (B, C), dtype=jnp.float32)
    targets = jax.random.randint(k3, (B,), 0, C, dtype=jnp.int32)
    targets = targets.at[1].set(-1).at[5].set(-1)   # some ignored samples

    loss = emocot_loss([pred0, pred1], targets)
    jax.block_until_ready(loss)
    ref = emocot_loss_ref([pred0, pred1], targets)
    assert jnp.allclose(loss, ref, rtol=2e-4, atol=2e-4), (loss, ref)

    # --- test 2: multi-block grid + ragged batch (padding path, D=3) ------
    k4, k5, k6, k7 = jax.random.split(jax.random.PRNGKey(1), 4)
    B2, C2 = 22, 16
    preds2 = [jax.random.normal(k, (B2, C2), dtype=jnp.float32)
              for k in (k4, k5, k6)]
    targets2 = jax.random.randint(k7, (B2,), 0, C2, dtype=jnp.int32)
    targets2 = targets2.at[0].set(-1).at[13].set(-1)

    loss2 = emocot_loss(preds2, targets2, block_b=8)   # 3 blocks, 2 pad rows
    jax.block_until_ready(loss2)
    ref2 = emocot_loss_ref(preds2, targets2)
    assert jnp.allclose(loss2, ref2, rtol=2e-4, atol=2e-4), (loss2, ref2)

    print("KERNEL_OK")
</pallas_src>

<mosaic_0001>
module attributes {stable_mosaic.version = 11 : i64} {
  func.func @_emocot_kernel(%arg0: i32, %arg1: memref<8x1xi32, #tpu.memory_space<vmem>>, %arg2: memref<8x8xf32, #tpu.memory_space<vmem>>, %arg3: memref<8x8xf32, #tpu.memory_space<vmem>>, %arg4: memref<1x3xf32, #tpu.memory_space<smem>>) attributes {dimension_semantics = [#tpu.dimension_semantics<parallel>], iteration_bounds = array<i64: 1>, scalar_prefetch = 0 : i64, scratch_operands = 0 : i64, tpu.core_type = #tpu.core_type<tc>, window_params = [{transform_indices = @transform_0, window_bounds = array<i64: 8, 1>}, {transform_indices = @transform_1, window_bounds = array<i64: 8, 8>}, {transform_indices = @transform_2, window_bounds = array<i64: 8, 8>}, {transform_indices = @transform_3, window_bounds = array<i64: 1, 3>}]} {
    %c0 = arith.constant 0 : index
    %c0_0 = arith.constant 0 : index
    %0 = vector.load %arg1[%c0, %c0_0] : memref<8x1xi32, #tpu.memory_space<vmem>>, vector<8x1xi32>
    %c-1_i32 = arith.constant -1 : i32
    %1 = vector.broadcast %c-1_i32 : i32 to vector<8x1xi32>
    %2 = arith.cmpi ne, %0, %1 : vector<8x1xi32>
    %3 = arith.extui %2 : vector<8x1xi1> to vector<8x1xi32>
    %4 = arith.sitofp %3 : vector<8x1xi32> to vector<8x1xf32>
    %5 = tpu.iota {dimensions = array<i32: 0>} : vector<8x1xi32>
    %c8_i32 = arith.constant 8 : i32
    %6 = arith.muli %arg0, %c8_i32 : i32
    %7 = vector.broadcast %6 : i32 to vector<8x1xi32>
    %8 = arith.addi %5, %7 : vector<8x1xi32>
    %c8_i32_1 = arith.constant 8 : i32
    %9 = vector.broadcast %c8_i32_1 : i32 to vector<8x1xi32>
    %10 = arith.cmpi slt, %8, %9 : vector<8x1xi32>
    %11 = arith.extui %10 : vector<8x1xi1> to vector<8x1xi32>
    %12 = arith.sitofp %11 : vector<8x1xi32> to vector<8x1xf32>
    %13 = tpu.iota {dimensions = array<i32: 1>} : vector<8x8xi32>
    %c0_i32 = arith.constant 0 : i32
    %14 = vector.broadcast %c0_i32 : i32 to vector<8x1xi32>
    %15 = arith.select %2, %0, %14 : vector<8x1xi1>, vector<8x1xi32>
    %16 = vector.broadcast %15 : vector<8x1xi32> to vector<8x8xi32>
    %17 = arith.cmpi eq, %13, %16 : vector<8x8xi32>
    %cst = arith.constant 0.000000e+00 : f32
    %18 = vector.broadcast %cst : f32 to vector<8x8xf32>
    %c0_2 = arith.constant 0 : index
    %c0_3 = arith.constant 0 : index
    %19 = vector.load %arg2[%c0_2, %c0_3] : memref<8x8xf32, #tpu.memory_space<vmem>>, vector<8x8xf32>
    %cst_4 = arith.constant dense<0xFF800000> : vector<8xf32>
    %20 = vector.multi_reduction <maximumf>, %19, %cst_4 [1] : vector<8x8xf32> to vector<8xf32>
    %21 = vector.shape_cast %20 : vector<8xf32> to vector<8x1xf32>
    %22 = vector.broadcast %21 : vector<8x1xf32> to vector<8x8xf32>
    %23 = arith.subf %19, %22 : vector<8x8xf32>
    %24 = math.exp %23 : vector<8x8xf32>
    %cst_5 = arith.constant dense<0.000000e+00> : vector<8xf32>
    %25 = vector.multi_reduction <add>, %24, %cst_5 [1] : vector<8x8xf32> to vector<8xf32>
    %26 = vector.shape_cast %25 : vector<8xf32> to vector<8x1xf32>
    %27 = math.log %26 : vector<8x1xf32>
    %28 = vector.broadcast %27 : vector<8x1xf32> to vector<8x8xf32>
    %29 = arith.subf %23, %28 : vector<8x8xf32>
    %30 = tpu.reciprocal %26 : vector<8x1xf32> -> vector<8x1xf32>
    %31 = vector.broadcast %30 : vector<8x1xf32> to vector<8x8xf32>
    %32 = arith.mulf %24, %31 : vector<8x8xf32>
    %cst_6 = arith.constant 0.000000e+00 : f32
    %33 = vector.broadcast %cst_6 : f32 to vector<8x8xf32>
    %34 = arith.select %17, %29, %33 : vector<8x8xi1>, vector<8x8xf32>
    %cst_7 = arith.constant dense<0.000000e+00> : vector<8xf32>
    %35 = vector.multi_reduction <add>, %34, %cst_7 [1] : vector<8x8xf32> to vector<8xf32>
    %36 = vector.shape_cast %35 : vector<8xf32> to vector<8x1xf32>
    %cst_8 = arith.constant 0.000000e+00 : f32
    %37 = vector.broadcast %cst_8 : f32 to vector<8x1xf32>
    %38 = arith.subf %37, %36 : vector<8x1xf32>
    %39 = arith.mulf %38, %4 : vector<8x1xf32>
    %40 = vector.shape_cast %39 : vector<8x1xf32> to vector<1x8x1xf32>
    %cst_9 = arith.constant dense<0.000000e+00> : vector<1xf32>
    %41 = vector.multi_reduction <add>, %40, %cst_9 [1, 2] : vector<1x8x1xf32> to vector<1xf32>
    %42 = vector.shape_cast %41 : vector<1xf32> to vector<1x1x1xf32>
    %43 = vector.extract %42[0, 0, 0] : f32 from vector<1x1x1xf32>
    %cst_10 = arith.constant 0.000000e+00 : f32
    %44 = arith.addf %cst_10, %43 : f32
    %45 = vector.broadcast %12 : vector<8x1xf32> to vector<8x8xf32>
    %46 = arith.mulf %32, %45 : vector<8x8xf32>
    %cst_11 = arith.constant -9.21034049 : f32
    %47 = vector.broadcast %cst_11 : f32 to vector<8x8xf32>
    %48 = arith.maximumf %29, %47 : vector<8x8xf32>
    %49 = arith.mulf %46, %48 : vector<8x8xf32>
    %50 = vector.shape_cast %49 : vector<8x8xf32> to vector<1x8x8xf32>
    %cst_12 = arith.constant dense<0.000000e+00> : vector<1xf32>
    %51 = vector.multi_reduction <add>, %50, %cst_12 [1, 2] : vector<1x8x8xf32> to vector<1xf32>
    %52 = vector.shape_cast %51 : vector<1xf32> to vector<1x1x1xf32>
    %53 = vector.extract %52[0, 0, 0] : f32 from vector<1x1x1xf32>
    %cst_13 = arith.constant 0.000000e+00 : f32
    %54 = arith.addf %cst_13, %53 : f32
    %55 = arith.addf %18, %46 : vector<8x8xf32>
    %c0_14 = arith.constant 0 : index
    %c0_15 = arith.constant 0 : index
    %56 = vector.load %arg3[%c0_14, %c0_15] : memref<8x8xf32, #tpu.memory_space<vmem>>, vector<8x8xf32>
    %cst_16 = arith.constant dense<0xFF800000> : vector<8xf32>
    %57 = vector.multi_reduction <maximumf>, %56, %cst_16 [1] : vector<8x8xf32> to vector<8xf32>
    %58 = vector.shape_cast %57 : vector<8xf32> to vector<8x1xf32>
    %59 = vector.broadcast %58 : vector<8x1xf32> to vector<8x8xf32>
    %60 = arith.subf %56, %59 : vector<8x8xf32>
    %61 = math.exp %60 : vector<8x8xf32>
    %cst_17 = arith.constant dense<0.000000e+00> : vector<8xf32>
    %62 = vector.multi_reduction <add>, %61, %cst_17 [1] : vector<8x8xf32> to vector<8xf32>
    %63 = vector.shape_cast %62 : vector<8xf32> to vector<8x1xf32>
    %64 = math.log %63 : vector<8x1xf32>
    %65 = vector.broadcast %64 : vector<8x1xf32> to vector<8x8xf32>
    %66 = arith.subf %60, %65 : vector<8x8xf32>
    %67 = tpu.reciprocal %63 : vector<8x1xf32> -> vector<8x1xf32>
    %68 = vector.broadcast %67 : vector<8x1xf32> to vector<8x8xf32>
    %69 = arith.mulf %61, %68 : vector<8x8xf32>
    %cst_18 = arith.constant 0.000000e+00 : f32
    %70 = vector.broadcast %cst_18 : f32 to vector<8x8xf32>
    %71 = arith.select %17, %66, %70 : vector<8x8xi1>, vector<8x8xf32>
    %cst_19 = arith.constant dense<0.000000e+00> : vector<8xf32>
    %72 = vector.multi_reduction <add>, %71, %cst_19 [1] : vector<8x8xf32> to vector<8xf32>
    %73 = vector.shape_cast %72 : vector<8xf32> to vector<8x1xf32>
    %cst_20 = arith.constant 0.000000e+00 : f32
    %74 = vector.broadcast %cst_20 : f32 to vector<8x1xf32>
    %75 = arith.subf %74, %73 : vector<8x1xf32>
    %76 = arith.mulf %75, %4 : vector<8x1xf32>
    %77 = vector.shape_cast %76 : vector<8x1xf32> to vector<1x8x1xf32>
    %cst_21 = arith.constant dense<0.000000e+00> : vector<1xf32>
    %78 = vector.multi_reduction <add>, %77, %cst_21 [1, 2] : vector<1x8x1xf32> to vector<1xf32>
    %79 = vector.shape_cast %78 : vector<1xf32> to vector<1x1x1xf32>
    %80 = vector.extract %79[0, 0, 0] : f32 from vector<1x1x1xf32>
    %81 = arith.addf %44, %80 : f32
    %82 = vector.broadcast %12 : vector<8x1xf32> to vector<8x8xf32>
    %83 = arith.mulf %69, %82 : vector<8x8xf32>
    %cst_22 = arith.constant -9.21034049 : f32
    %84 = vector.broadcast %cst_22 : f32 to vector<8x8xf32>
    %85 = arith.maximumf %66, %84 : vector<8x8xf32>
    %86 = arith.mulf %83, %85 : vector<8x8xf32>
    %87 = vector.shape_cast %86 : vector<8x8xf32> to vector<1x8x8xf32>
    %cst_23 = arith.constant dense<0.000000e+00> : vector<1xf32>
    %88 = vector.multi_reduction <add>, %87, %cst_23 [1, 2] : vector<1x8x8xf32> to vector<1xf32>
    %89 = vector.shape_cast %88 : vector<1xf32> to vector<1x1x1xf32>
    %90 = vector.extract %89[0, 0, 0] : f32 from vector<1x1x1xf32>
    %91 = arith.addf %54, %90 : f32
    %92 = arith.addf %55, %83 : vector<8x8xf32>
    %cst_24 = arith.constant 5.000000e-01 : f32
    %93 = vector.broadcast %cst_24 : f32 to vector<8x8xf32>
    %94 = arith.mulf %92, %93 : vector<8x8xf32>
    %cst_25 = arith.constant 9.99999974E-5 : f32
    %95 = vector.broadcast %cst_25 : f32 to vector<8x8xf32>
    %96 = arith.maximumf %94, %95 : vector<8x8xf32>
    %97 = math.log %96 : vector<8x8xf32>
    %98 = arith.mulf %92, %97 : vector<8x8xf32>
    %99 = vector.shape_cast %98 : vector<8x8xf32> to vector<1x8x8xf32>
    %cst_26 = arith.constant dense<0.000000e+00> : vector<1xf32>
    %100 = vector.multi_reduction <add>, %99, %cst_26 [1, 2] : vector<1x8x8xf32> to vector<1xf32>
    %101 = vector.shape_cast %100 : vector<1xf32> to vector<1x1x1xf32>
    %102 = vector.extract %101[0, 0, 0] : f32 from vector<1x1x1xf32>
    %103 = arith.subf %91, %102 : f32
    %c0_27 = arith.constant 0 : index
    %c0_28 = arith.constant 0 : index
    %104 = memref.load %arg4[%c0_27, %c0_28] : memref<1x3xf32, #tpu.memory_space<smem>>
    memref.store %81, %arg4[%c0_27, %c0_28] : memref<1x3xf32, #tpu.memory_space<smem>>
    %105 = vector.shape_cast %4 : vector<8x1xf32> to vector<1x8x1xf32>
    %cst_29 = arith.constant dense<0.000000e+00> : vector<1xf32>
    %106 = vector.multi_reduction <add>, %105, %cst_29 [1, 2] : vector<1x8x1xf32> to vector<1xf32>
    %107 = vector.shape_cast %106 : vector<1xf32> to vector<1x1x1xf32>
    %108 = vector.extract %107[0, 0, 0] : f32 from vector<1x1x1xf32>
    %c0_30 = arith.constant 0 : index
    %c1 = arith.constant 1 : index
    %109 = memref.load %arg4[%c0_30, %c1] : memref<1x3xf32, #tpu.memory_space<smem>>
    memref.store %108, %arg4[%c0_30, %c1] : memref<1x3xf32, #tpu.memory_space<smem>>
    %c0_31 = arith.constant 0 : index
    %c2 = arith.constant 2 : index
    %110 = memref.load %arg4[%c0_31, %c2] : memref<1x3xf32, #tpu.memory_space<smem>>
    memref.store %103, %arg4[%c0_31, %c2] : memref<1x3xf32, #tpu.memory_space<smem>>
    return
  }
  func.func @transform_0(%arg0: i32) -> (i32, i32) {
    %c0_i32 = arith.constant 0 : i32
    %c0_i32_0 = arith.constant 0 : i32
    return %arg0, %c0_i32 : i32, i32
  }
  func.func @transform_1(%arg0: i32) -> (i32, i32) {
    %c0_i32 = arith.constant 0 : i32
    %c0_i32_0 = arith.constant 0 : i32
    return %arg0, %c0_i32 : i32, i32
  }
  func.func @transform_2(%arg0: i32) -> (i32, i32) {
    %c0_i32 = arith.constant 0 : i32
    %c0_i32_0 = arith.constant 0 : i32
    return %arg0, %c0_i32 : i32, i32
  }
  func.func @transform_3(%arg0: i32) -> (i32, i32) {
    %c0_i32 = arith.constant 0 : i32
    %c0_i32_0 = arith.constant 0 : i32
    return %arg0, %c0_i32 : i32, i32
  }
}

</mosaic_0001>

<bundles_post_ra>
// kernel: tpu_custom_call.1
= control target key start
LH: loop header
LB: loop body
LE: loop exit
PB: predicated region body
PF: predicated region fallthrough
CT: control target
= control target key end

     0   :  { %8 = vsyncpa [#allocation3], 0  ;;  %s305_s0 = inlined_call_operand.vmem [shape: s32[8,1], index: 0, kind: input, shape index: {}]   ;;  %s306_s1 = inlined_call_operand.vmem [shape: f32[8,8], index: 1, kind: input, shape index: {}]   ;;  %s307_s2 = inlined_call_operand.hbm [shape: f32[8,8], index: 2, kind: input, shape index: {}]   ;;  %s308_s3 = inlined_call_operand.hbm [shape: f32[1,3], index: 3, kind: output, shape index: {}]  }
   0x1   :  { %9 = vsyncpa [#allocation4], 0  ;;  %s252_s12 = smov [#allocation2]  }
   0x2   :  { %s20_s13 = sshll.u32 %s252_s12, 4  ;;  %s21_s13 = int_to_ptr.vmem [resolvable:$true] %s20_s13 }
   0x3   :  { %s228_s14 = scalar_lea.vmem %s21_s13, 128  ;;  %p233_p1 = scmp.lt.s32.totalorder %s21_s13, %s21_s13 }
   0x4   :  { %p229_p0 = scmp.ne.s32.totalorder %s21_s13, %s228_s14  ;;  %p234_p2 = scmp.lt.s32.totalorder %s228_s14, %s228_s14 }
   0x6   :  { %p235_p3 = por %p234_p2, %p233_p1 }
   0x8   :  { %p236_p4 = pnand %p235_p3, %p229_p0 }
   0xa   :  { %239 = shalt.err (!%p236_p4)
}
   0xb   :  { %23 = dma.hbm_to_vmem [thread:$0]  %s307_s2, 128, %s21_s13, [#allocation3]  }
   0xc   :  { %248 = dma.done.wait [#allocation3], 128  }
   0xd   :  { %249 = vsyncadd [#allocation3], 4294967168  ;;  %vm47_vm0 = vcmask 64512   ;;  %v46_v0 = vld [vmem:[%s306_s1] sm:$0xff]  ;;  %v253_v5 = vmov 0   ;;  %v39_v19 = vlaneseq  ;;  %v254_v49 = vmov 0.0  }
   0xe   :  { %v95_v1 = vld [vmem:[#allocation2] sm:$0xff]  ;;  %v48_v2 = vsel %vm47_vm0, %v46_v0, -inf  ;;  %205 = vset.pattern.permute.xlu0 %v253_v5  ;;  %vm68_vm3 = vcmask 7168   ;;  %s255_s27 = smov [#allocation5]  }
   0xf   :  { %49 = vmax.xlane.f32.xlu0 %v48_v2  ;;  %v96_v3 = vsel %vm47_vm0, %v95_v1, -inf  ;;  %v287_v4 = vld [vmem:[%s305_s0] sm:$0xff]  ;;  %v40_v20 = vand.u32 127, %v39_v19 }
  0x10   :  { %vm28_vm1 = vcmp.ne.s32.totalorder %v287_v4, 4294967295 }
  0x11   :  { %v41_v6 = vsel %vm28_vm1, %v287_v4, 0  ;;  %v188_v50 = vsel %vm28_vm1, 1.0, %v254_v49 }
  0x12   :  { %v160_v59 = vsel %vm68_vm3, %v188_v50, 0.0 }
  0x13   :  { %97 = vmax.xlane.f32.xlu0 %v96_v3 }
  0x29   :  { %43 = vperm.xlu0 %205, %v41_v6  }
  0x98   :  { %v50_v7 = vpop.xlane.xlu0 %49 }
  0x99   :  { %v51_v8 = vsub.f32 %v46_v0, %v50_v7 }
  0x9b   :  { %v52_v9 = vmul.f32 1.442695, %v51_v8 }
  0x9c   :  { %v98_v10 = vpop.xlane.xlu0 %97 }
  0x9d   :  { %206 = vpow2.f32 %v52_v9  ;;  %v99_v11 = vsub.f32 %v95_v1, %v98_v10 }
  0x9f   :  { %v100_v12 = vmul.f32 1.442695, %v99_v11 }
  0xa1   :  { %208 = vpow2.f32 %v100_v12 }
  0xa4   :  { %v44_v21 = vpop.permute.xlu0 %43 }
  0xa5   :  { %vm45_vm2 = vcmp.eq.s32.totalorder %v40_v20, %v44_v21 }
  0xaa   :  { %v207_v13 = vpop.eup %206 }
  0xab   :  { %v54_v14 = vsel %vm47_vm0, %v207_v13, 0.0 }
  0xac   :  { %55 = vadd.xlane.f32.xlu1 %v54_v14 }
  0xae   :  { %v209_v15 = vpop.eup %208 }
  0xaf   :  { %v102_v16 = vsel %vm47_vm0, %v209_v15, 0.0 }
  0xb0   :  { %103 = vadd.xlane.f32.xlu1 %v102_v16 }
 0x135   :  { %v56_v17 = vpop.xlane.xlu1 %55 }
 0x136   :  { %210 = vlog2.f32 %v56_v17 }
 0x137   :  { %212 = vrcp.f32 %v56_v17 }
 0x139   :  { %v104_v18 = vpop.xlane.xlu1 %103 }
 0x13a   :  { %214 = vlog2.f32 %v104_v18 }
 0x13b   :  { %216 = vrcp.f32 %v104_v18 }
 0x143   :  { %v211_v22 = vpop.eup %210 }
 0x144   :  { %v58_v23 = vmul.f32 0.6931472, %v211_v22  ;;  %v213_v24 = vpop.eup %212 }
 0x145   :  { %v61_v31 = vmul.f32 %v213_v24, %v207_v13 }
 0x146   :  { %v59_v25 = vsub.f32 %v51_v8, %v58_v23 }
 0x147   :  { %v215_v26 = vpop.eup %214 }
 0x148   :  { %v217_v27 = vpop.eup %216  ;;  %v106_v28 = vmul.f32 0.6931472, %v215_v26  ;;  %v62_v29 = vsel %vm45_vm2, %v59_v25, 0.0  ;;  %v81_v32 = vmax.f32 %v59_v25, -9.2103405 }
 0x149   :  { %v63_v30 = vsel %vm47_vm0, %v62_v29, 0.0  ;;  %v109_v33 = vmul.f32 %v217_v27, %v209_v15 }
 0x14a   :  { %64 = vadd.xlane.f32.xlu1 %v63_v30  ;;  %v107_v34 = vsub.f32 %v99_v11, %v106_v28  ;;  %v82_v38 = vmul.f32 %v81_v32, %v61_v31 }
 0x14b   :  { %v141_v35 = vadd.f32 %v109_v33, %v61_v31 }
 0x14c   :  { %v110_v36 = vsel %vm45_vm2, %v107_v34, 0.0  ;;  %v128_v39 = vmax.f32 %v107_v34, -9.2103405  ;;  %v83_v42 = vsel %vm47_vm0, %v82_v38, 0.0 }
 0x14d   :  { %v111_v37 = vsel %vm47_vm0, %v110_v36, 0.0  ;;  %v142_v40 = vmul.f32 0.5, %v141_v35 }
 0x14e   :  { %112 = vadd.xlane.f32.xlu1 %v111_v37  ;;  %v129_v43 = vmul.f32 %v128_v39, %v109_v33 }
 0x14f   :  { %v143_v41 = vmax.f32 %v142_v40, 0.0001 }
 0x150   :  { %v130_v44 = vsel %vm47_vm0, %v129_v43, 0.0 }
 0x151   :  { %218 = vlog2.f32 %v143_v41 }
 0x152   :  { %84 = vadd.xlane.f32.xlu1 %v83_v42 }
 0x156   :  { %131 = vadd.xlane.f32.xlu1 %v130_v44 }
 0x15e   :  { %v219_v45 = vpop.eup %218 }
 0x15f   :  { %v145_v46 = vmul.f32 0.6931472, %v219_v45 }
 0x161   :  { %v146_v47 = vmul.f32 %v145_v46, %v141_v35 }
 0x163   :  { %v147_v48 = vsel %vm47_vm0, %v146_v47, 0.0 }
 0x164   :  { %148 = vadd.xlane.f32.xlu1 %v147_v48 }
 0x1d3   :  { %v65_v51 = vpop.xlane.xlu1 %64 }
 0x1d4   :  { %v66_v52 = vsub.f32 0.0, %v65_v51 }
 0x1d6   :  { %v67_v53 = vmul.f32 %v188_v50, %v66_v52 }
 0x1d7   :  { %v113_v54 = vpop.xlane.xlu1 %112 }
 0x1d8   :  { %v114_v55 = vsub.f32 0.0, %v113_v54  ;;  %v69_v56 = vsel %vm68_vm3, %v67_v53, 0.0 }
 0x1d9   :  { %70 = vadd.xlane.f32.xlu1 %v69_v56 }
 0x1da   :  { %v115_v57 = vmul.f32 %v188_v50, %v114_v55 }
 0x1db   :  { %v85_v60 = vpop.xlane.xlu1 %84 }
 0x1dc   :  { %v116_v58 = vsel %vm68_vm3, %v115_v57, 0.0  ;;  %v86_v62 = vrot.slane %v85_v60, 4 }
 0x1dd   :  { %117 = vadd.xlane.f32.xlu1 %v116_v58 }
 0x1de   :  { %v87_v0 = vadd.f32 %v86_v62, %v85_v60 }
 0x1df   :  { %v132_v61 = vpop.xlane.xlu1 %131 }
 0x1e0   :  { %v133_v1 = vrot.slane %v132_v61, 4  ;;  %v88_v3 = vrot.slane %v87_v0, 2 }
 0x1e1   :  { %161 = vadd.xlane.f32.xlu1 %v160_v59 }
 0x1e2   :  { %v134_v4 = vadd.f32 %v133_v1, %v132_v61  ;;  %v89_v11 = vadd.f32 %v88_v3, %v87_v0 }
 0x1e4   :  { %v135_v9 = vrot.slane %v134_v4, 2  ;;  %v90_v18 = vrot.slane %v89_v11, 1 }
 0x1e6   :  { %v136_v19 = vadd.f32 %v135_v9, %v134_v4  ;;  %v91_v27 = vadd.f32 %v90_v18, %v89_v11 }
 0x1e8   :  { %v137_v28 = vrot.slane %v136_v19, 1 }
 0x1ea   :  { %v138_v34 = vadd.f32 %v137_v28, %v136_v19 }
 0x1ed   :  { %v149_v63 = vpop.xlane.xlu1 %148 }
 0x1ee   :  { %v150_v2 = vrot.slane %v149_v63, 4 }
 0x1f0   :  { %v151_v6 = vadd.f32 %v150_v2, %v149_v63 }
 0x1f2   :  { %v152_v12 = vrot.slane %v151_v6, 2 }
 0x1f4   :  { %v153_v23 = vadd.f32 %v152_v12, %v151_v6 }
 0x1f6   :  { %v154_v31 = vrot.slane %v153_v23, 1 }
 0x1f8   :  { %v155_v35 = vadd.f32 %v154_v31, %v153_v23 }
 0x262   :  { %v71_v5 = vpop.xlane.xlu1 %70 }
 0x263   :  { %v72_v7 = vrot.slane %v71_v5, 4 }
 0x265   :  { %v73_v8 = vadd.f32 %v72_v7, %v71_v5 }
 0x266   :  { %v118_v10 = vpop.xlane.xlu1 %117 }
 0x267   :  { %v74_v13 = vrot.slane %v73_v8, 2  ;;  %v119_v14 = vrot.slane %v118_v10, 4 }
 0x269   :  { %v120_v15 = vadd.f32 %v119_v14, %v118_v10  ;;  %v75_v16 = vadd.f32 %v74_v13, %v73_v8 }
 0x26a   :  { %v162_v17 = vpop.xlane.xlu1 %161 }
 0x26b   :  { %v121_v20 = vrot.slane %v120_v15, 2  ;;  %v163_v21 = vrot.slane %v162_v17, 4  ;;  %v76_v22 = vrot.slane %v75_v16, 1 }
 0x26d   :  { %v164_v24 = vadd.f32 %v163_v21, %v162_v17  ;;  %v77_v25 = vadd.f32 %v76_v22, %v75_v16  ;;  %v122_v26 = vadd.f32 %v121_v20, %v120_v15 }
 0x26f   :  { %v165_v29 = vrot.slane %v164_v24, 2  ;;  %189 = vpush %v77_v25  ;;  %v123_v30 = vrot.slane %v122_v26, 1 }
 0x270   :  { %191 = vpush %v91_v27 }
 0x271   :  { %v166_v32 = vadd.f32 %v165_v29, %v164_v24  ;;  %v124_v33 = vadd.f32 %v123_v30, %v122_v26 }
 0x273   :  { %193 = vpush %v124_v33  ;;  %v167_v36 = vrot.slane %v166_v32, 1 }
 0x274   :  { %195 = vpush %v138_v34 }
 0x275   :  { %197 = vpush %v155_v35  ;;  %v168_v37 = vadd.f32 %v167_v36, %v166_v32 }
 0x277   :  { %199 = vpush %v168_v37 }
 0x2a0   :  { %s190_s0 = spop %189 }
 0x2a1   :  { %s192_s1 = spop %191 }
 0x2a4   :  { %s194_s2 = spop %193 }
 0x2a5   :  { %s126_s21 = sadd.f32 %s194_s2, %s190_s0  ;;  %s196_s22 = spop %195 }
 0x2a6   :  { %s140_s23 = sadd.f32 %s196_s22, %s192_s1  ;;  %s198_s24 = spop %197 }
 0x2a7   :  { %159 = sst [smem:[#allocation5]] %s126_s21 }
 0x2a8   :  { %s157_s25 = ssub.f32 %s140_s23, %s198_s24  ;;  %s200_s26 = spop %199 }
 0x2a9   :  { %171 = sst [smem:[#allocation5 + $0x1]] %s200_s26 }
 0x2aa   :  { %173 = sst [smem:[#allocation5 + $0x2]] %s157_s25 }
 0x2ab   :  { %181 = dma.smem_to_hbm %s255_s27, 16, %s308_s3, [#allocation4]  }
 0x2ac   :  { %250 = dma.done.wait [#allocation4], 16  }
 0x2ad   :  { %251 = vsyncadd [#allocation4], 4294967280 }
 0x2ae   :  { %185 = sfence }
 0x2af   :  { %186 = vsyncpa [#allocation3], 1 }
 0x2b0   :  { %187 = vsyncpa [#allocation4], 1 }

</bundles_post_ra>
